<compile_context>
chip_gen: v6e
topology: v6e:2x2x1
jax: 0.10.0
libtpu: 0.0.40
codegen_flags: <defaults>
</compile_context>

<pallas_src>
import functools

import jax
import jax.numpy as jnp
from jax.experimental import pallas as pl
from jax.experimental.pallas import tpu as pltpu

CLAMP_MIN = 1e-8      # Boundary_GDiceLoss.smooth (clamp floor on predict)
GDICE_SMOOTH = 1e-5   # GDiceLoss.smooth
W_EPS = 1e-10         # epsilon inside the generalized-dice class weights

LANE = 128
SUBLANE = 8

# Scoped-VMEM limit requested from the compiler (safe on v5e/v6e 128 MiB and
# v7x 64 MiB physical) and the per-step budget used when sizing blocks.  The
# budget counts: 2 inputs x 2 pipeline buffers (native dtype) + 3 full-size
# f32 temporaries (clamped pred, cast gt, pred*gt) the kernel body may
# materialize.
VMEM_LIMIT_BYTES = 48 * 1024 * 1024
VMEM_BUDGET_BYTES = 36 * 1024 * 1024


def _choose_tiling(B, C, r_valid, itemsize, budget):
    """Pick (batch_tile, tile_rows, n_row_tiles, ragged) for (B,C,rows,128)."""
    per_row_in = C * LANE * itemsize                   # one input block, per row
    per_row_cost = 4 * per_row_in + 3 * C * LANE * 4   # 2 in x 2 bufs + 3 f32 temps
    rows_budget = max(SUBLANE, (budget // per_row_cost) // SUBLANE * SUBLANE)

    if r_valid <= rows_budget:
        # Whole spatial extent in one step; block several batch samples per
        # step so small images still issue large DMAs.
        bt = 1
        for d in range(2, B + 1):
            if B % d == 0 and d * r_valid * per_row_cost <= budget:
                bt = d
        return bt, r_valid, 1, False

    # Spatial tiling, one sample per step.  Prefer an exact divisor of the row
    # count (no ragged tile -> no mask); otherwise use a cdiv grid and mask
    # only the last, partial tile in-kernel.  Rows are never padded in HBM.
    lo = max(SUBLANE, (rows_budget // 2) // SUBLANE * SUBLANE)
    for d in range(rows_budget, lo - 1, -SUBLANE):
        if r_valid % d == 0:
            return 1, d, r_valid // d, False
    return 1, rows_budget, pl.cdiv(r_valid, rows_budget), True


def _loss_kernel(alpha_ref, pred_ref, gt_ref, out_ref,
                 sgt_ref, spred_ref, spg_ref, *,
                 inv_n, pad_corr, tile_rows, rows_last, ragged):
    # pred_ref / gt_ref block: (Bt, C, tile_rows, 128); out_ref block: (Bt, 1)
    t = pl.program_id(1)
    n_t = pl.num_programs(1)

    @pl.when(t == 0)
    def _init():
        sgt_ref[...] = jnp.zeros_like(sgt_ref)
        spred_ref[...] = jnp.zeros_like(spred_ref)
        spg_ref[...] = jnp.zeros_like(spg_ref)

    pred = jnp.maximum(pred_ref[...].astype(jnp.float32), CLAMP_MIN)  # clamp(min=smooth)
    gt = gt_ref[...].astype(jnp.float32)

    def accumulate(p, g):
        # Lane-resident partial sums: reduce only the row axis per tile (VALU
        # adds); the cross-lane XLU reduce happens once, in finalize.
        sgt_ref[...] += jnp.sum(g, axis=2)          # einsum('bcxy->bc') partials
        spred_ref[...] += jnp.sum(p, axis=2)
        spg_ref[...] += jnp.sum(p * g, axis=2)      # einsum('bcxy,bcxy->bc') partials

    if ragged:
        @pl.when(t != n_t - 1)
        def _full_tile():
            accumulate(pred, gt)

        @pl.when(t == n_t - 1)
        def _last_tile():
            # Only the last (partial) tile pays for a mask: rows past the end
            # of the array hold unspecified data and must not contribute.
            row = jax.lax.broadcasted_iota(jnp.int32, (1, 1, tile_rows, LANE), 2)
            valid = row < rows_last
            accumulate(jnp.where(valid, pred, 0.0), jnp.where(valid, gt, 0.0))
    else:
        accumulate(pred, gt)

    @pl.when(t == n_t - 1)
    def _finalize():
        alpha = alpha_ref[0]
        sum_gt = jnp.sum(sgt_ref[...], axis=2)              # (Bt, C)
        sum_pred = jnp.sum(spred_ref[...], axis=2)
        sum_pg = jnp.sum(spg_ref[...], axis=2)
        if pad_corr:
            # Flat spatial padding (HW -> multiple of 128) is zero in HBM but
            # gets clamped up to CLAMP_MIN in pred; subtract its exact
            # contribution per channel (exact, one flop per channel).
            sum_pred = sum_pred - pad_corr

        w = 1.0 / (sum_gt + W_EPS) ** 2
        intersection = jnp.sum(w * sum_pg, axis=1)          # einsum('bc->b')
        union = jnp.sum(w * (sum_pred + sum_gt), axis=1)    # einsum('bc->b')
        gdc = 1.0 - 2.0 * (intersection + GDICE_SMOOTH) / (union + GDICE_SMOOTH)

        # TODO(synk): BoundaryLoss source was not provided with the module; use
        # the surface-loss (Kervadec et al.) stand-in mean(pred * target) per
        # sample, derived from the already-computed sum_pg reduction.
        bd = jnp.sum(sum_pg, axis=1) * inv_n

        out_ref[...] = (alpha * gdc + (1.0 - alpha) * bd)[:, None]


def boundary_gdice_loss(predict, target, *, per_epoch=100, resume_iter=0,
                        reduction="none", vmem_budget_bytes=VMEM_BUDGET_BYTES):
    assert predict.shape[0] == target.shape[0], \
        "predict & target batch size don't match"
    B, C, H, W = predict.shape
    HW = H * W

    # alpha schedule from __init__ (the iteration-dependent decay is host-side
    # training-state bookkeeping, not part of a single forward's math).
    # Passed as an SMEM scalar so changing it never triggers a recompile.
    alpha = 1.0 - (resume_iter // per_epoch) * 0.01
    alpha_arr = jnp.asarray([alpha], dtype=jnp.float32)

    itemsize = jnp.dtype(predict.dtype).itemsize

    # Lay the spatial axis out as (rows, 128): lane axis is dense even for a
    # tiny channel count; inputs stay in their native dtype on the wire.
    r_valid = pl.cdiv(HW, LANE)
    hw_pad = r_valid * LANE
    pred = predict.reshape(B, C, HW)
    tgt = target.reshape(B, C, HW)
    if hw_pad != HW:
        # Only when HW is not a multiple of 128 (the reshape requires it).
        padding = ((0, 0), (0, 0), (0, hw_pad - HW))
        pred = jnp.pad(pred, padding)
        tgt = jnp.pad(tgt, padding)
    pred = pred.reshape(B, C, r_valid, LANE)
    tgt = tgt.reshape(B, C, r_valid, LANE)
    pad_count = hw_pad - HW

    bt, tile_rows, n_tiles, ragged = _choose_tiling(
        B, C, r_valid, itemsize, vmem_budget_bytes)
    rows_last = r_valid - (n_tiles - 1) * tile_rows

    kernel = functools.partial(
        _loss_kernel,
        inv_n=1.0 / float(C * HW),
        pad_corr=float(pad_count) * CLAMP_MIN,
        tile_rows=tile_rows,
        rows_last=rows_last,
        ragged=ragged,
    )

    bytes_accessed = (pred.size * pred.dtype.itemsize
                      + tgt.size * tgt.dtype.itemsize + B * 4 + 4)

    out = pl.pallas_call(
        kernel,
        out_shape=jax.ShapeDtypeStruct((B, 1), jnp.float32),
        grid=(B // bt, n_tiles),
        in_specs=[
            pl.BlockSpec(memory_space=pltpu.MemorySpace.SMEM),             # alpha
            pl.BlockSpec((bt, C, tile_rows, LANE), lambda b, t: (b, 0, t, 0)),
            pl.BlockSpec((bt, C, tile_rows, LANE), lambda b, t: (b, 0, t, 0)),
        ],
        out_specs=pl.BlockSpec((bt, 1), lambda b, t: (b, 0)),
        scratch_shapes=[
            pltpu.VMEM((bt, C, LANE), jnp.float32),   # per-lane sum_gt
            pltpu.VMEM((bt, C, LANE), jnp.float32),   # per-lane sum_pred
            pltpu.VMEM((bt, C, LANE), jnp.float32),   # per-lane sum_pg
        ],
        compiler_params=pltpu.CompilerParams(
            dimension_semantics=("parallel", "arbitrary"),
            vmem_limit_bytes=VMEM_LIMIT_BYTES),
        cost_estimate=pl.CostEstimate(
            flops=4 * B * C * hw_pad,
            transcendentals=0,
            bytes_accessed=int(bytes_accessed)),
    )(alpha_arr, pred, tgt)

    loss = out[:, 0]
    if reduction == "mean":
        return loss.mean()
    elif reduction == "sum":
        return loss.sum()
    elif reduction == "none":
        return loss
    else:
        raise Exception("Unexpected reduction {}".format(reduction))


def _reference(predict, target, *, alpha=1.0):
    """Plain-JAX reference mirroring the PyTorch forward (for sanity check)."""
    pred = jnp.maximum(predict.astype(jnp.float32), CLAMP_MIN)
    gt = target.astype(jnp.float32)
    sum_gt = jnp.einsum("bcxy->bc", gt)
    sum_pred = jnp.einsum("bcxy->bc", pred)
    sum_pg = jnp.einsum("bcxy,bcxy->bc", pred, gt)
    w = 1.0 / (sum_gt + W_EPS) ** 2
    inter = jnp.sum(w * sum_pg, axis=1)
    union = jnp.sum(w * (sum_pred + sum_gt), axis=1)
    gdc = 1.0 - 2.0 * (inter + GDICE_SMOOTH) / (union + GDICE_SMOOTH)
    bd = jnp.mean(pred * gt, axis=(1, 2, 3))
    return alpha * gdc + (1.0 - alpha) * bd


def _make_inputs(key, B, C, H, W, dtype=jnp.float32):
    k1, k2 = jax.random.split(key)
    predict = jax.random.uniform(k1, (B, C, H, W), dtype=jnp.float32).astype(dtype)
    labels = jax.random.randint(k2, (B, H, W), 0, C)
    target = jnp.transpose(
        jax.nn.one_hot(labels, C, dtype=jnp.float32), (0, 3, 1, 2)).astype(dtype)
    return predict, target


if __name__ == "__main__":
    key = jax.random.PRNGKey(0)
    k_a, k_b, k_c, k_d = jax.random.split(key, 4)

    # Test 1: f32, HW divisible by 128 (no pad, single tile, batched samples).
    B, C, H, W = 2, 4, 16, 16
    predict, target = _make_inputs(k_a, B, C, H, W, jnp.float32)
    loss = boundary_gdice_loss(predict, target, per_epoch=100, resume_iter=0)
    loss = jax.block_until_ready(loss)
    ref = _reference(predict, target, alpha=1.0)
    assert loss.shape == (B,)
    assert jnp.allclose(loss, ref, atol=1e-5, rtol=1e-5), (loss, ref)

    # Test 2: HW NOT divisible by 128 -> flat pad + exact scalar correction.
    predict2, target2 = _make_inputs(k_b, 2, 4, 12, 12, jnp.float32)
    loss2 = jax.block_until_ready(
        boundary_gdice_loss(predict2, target2, per_epoch=100, resume_iter=250))
    ref2 = _reference(predict2, target2, alpha=1.0 - (250 // 100) * 0.01)
    assert jnp.allclose(loss2, ref2, atol=1e-5, rtol=1e-5), (loss2, ref2)

    # Test 3: bf16 inputs pass through the BlockSpec natively (half the bytes).
    predict3, target3 = _make_inputs(k_c, 2, 4, 16, 16, jnp.bfloat16)
    loss3 = jax.block_until_ready(
        boundary_gdice_loss(predict3, target3, per_epoch=100, resume_iter=0))
    ref3 = _reference(predict3, target3, alpha=1.0)
    assert jnp.allclose(loss3, ref3, atol=1e-4, rtol=1e-4), (loss3, ref3)

    # Test 4: force multi-tile spatial grid with a ragged (masked) last tile by
    # shrinking the VMEM budget (rows=36, tile_rows=8 -> 5 tiles, last has 4).
    predict4, target4 = _make_inputs(k_d, 2, 3, 48, 96, jnp.float32)
    loss4 = jax.block_until_ready(
        boundary_gdice_loss(predict4, target4, per_epoch=100, resume_iter=0,
                            vmem_budget_bytes=100_000))
    ref4 = _reference(predict4, target4, alpha=1.0)
    assert jnp.allclose(loss4, ref4, atol=1e-4, rtol=1e-4), (loss4, ref4)

    print("KERNEL_OK")
</pallas_src>

<mosaic_0001>
module attributes {stable_mosaic.version = 11 : i64} {
  func.func @_loss_kernel(%arg0: i32, %arg1: i32, %arg2: memref<1xf32, #tpu.memory_space<smem>>, %arg3: memref<2x4x2x128xf32, #tpu.memory_space<vmem>>, %arg4: memref<2x4x2x128xf32, #tpu.memory_space<vmem>>, %arg5: memref<2x1xf32, #tpu.memory_space<vmem>>, %arg6: memref<2x4x128xf32, #tpu.memory_space<vmem>>, %arg7: memref<2x4x128xf32, #tpu.memory_space<vmem>>, %arg8: memref<2x4x128xf32, #tpu.memory_space<vmem>>) attributes {dimension_semantics = [#tpu.dimension_semantics<parallel>, #tpu.dimension_semantics<arbitrary>], iteration_bounds = array<i64: 1, 1>, scalar_prefetch = 0 : i64, scratch_operands = 3 : i64, tpu.core_type = #tpu.core_type<tc>, window_params = [{transform_indices = @transform_0, window_bounds = array<i64: 1>}, {transform_indices = @transform_1, window_bounds = array<i64: 2, 4, 2, 128>}, {transform_indices = @transform_2, window_bounds = array<i64: 2, 4, 2, 128>}, {transform_indices = @transform_3, window_bounds = array<i64: 2, 1>}]} {
    %c0_i32 = arith.constant 0 : i32
    %0 = arith.cmpi eq, %arg1, %c0_i32 : i32
    %1 = arith.extui %0 : i1 to i32
    %c0_i32_0 = arith.constant 0 : i32
    %2 = arith.cmpi ne, %1, %c0_i32_0 : i32
    scf.if %2 {
      %cst_31 = arith.constant 0.000000e+00 : f32
      %23 = vector.broadcast %cst_31 : f32 to vector<2x4x128xf32>
      %c0_32 = arith.constant 0 : index
      %c0_33 = arith.constant 0 : index
      %c0_34 = arith.constant 0 : index
      %24 = vector.load %arg6[%c0_32, %c0_33, %c0_34] : memref<2x4x128xf32, #tpu.memory_space<vmem>>, vector<2x4x128xf32>
      tpu.vector_store %arg6[%c0_32, %c0_33, %c0_34], %23 {strides = array<i32>} : memref<2x4x128xf32, #tpu.memory_space<vmem>>, vector<2x4x128xf32>,
      %cst_35 = arith.constant 0.000000e+00 : f32
      %25 = vector.broadcast %cst_35 : f32 to vector<2x4x128xf32>
      %c0_36 = arith.constant 0 : index
      %c0_37 = arith.constant 0 : index
      %c0_38 = arith.constant 0 : index
      %26 = vector.load %arg7[%c0_36, %c0_37, %c0_38] : memref<2x4x128xf32, #tpu.memory_space<vmem>>, vector<2x4x128xf32>
      tpu.vector_store %arg7[%c0_36, %c0_37, %c0_38], %25 {strides = array<i32>} : memref<2x4x128xf32, #tpu.memory_space<vmem>>, vector<2x4x128xf32>,
      %cst_39 = arith.constant 0.000000e+00 : f32
      %27 = vector.broadcast %cst_39 : f32 to vector<2x4x128xf32>
      %c0_40 = arith.constant 0 : index
      %c0_41 = arith.constant 0 : index
      %c0_42 = arith.constant 0 : index
      %28 = vector.load %arg8[%c0_40, %c0_41, %c0_42] : memref<2x4x128xf32, #tpu.memory_space<vmem>>, vector<2x4x128xf32>
      tpu.vector_store %arg8[%c0_40, %c0_41, %c0_42], %27 {strides = array<i32>} : memref<2x4x128xf32, #tpu.memory_space<vmem>>, vector<2x4x128xf32>,
    } else {
    }
    %c0 = arith.constant 0 : index
    %c0_1 = arith.constant 0 : index
    %c0_2 = arith.constant 0 : index
    %c0_3 = arith.constant 0 : index
    %3 = vector.load %arg3[%c0, %c0_1, %c0_2, %c0_3] : memref<2x4x2x128xf32, #tpu.memory_space<vmem>>, vector<2x4x2x128xf32>
    %cst = arith.constant 9.99999993E-9 : f32
    %4 = vector.broadcast %cst : f32 to vector<2x4x2x128xf32>
    %5 = arith.maximumf %3, %4 : vector<2x4x2x128xf32>
    %c0_4 = arith.constant 0 : index
    %c0_5 = arith.constant 0 : index
    %c0_6 = arith.constant 0 : index
    %c0_7 = arith.constant 0 : index
    %6 = vector.load %arg4[%c0_4, %c0_5, %c0_6, %c0_7] : memref<2x4x2x128xf32, #tpu.memory_space<vmem>>, vector<2x4x2x128xf32>
    %c0_8 = arith.constant 0 : index
    %c0_9 = arith.constant 0 : index
    %c0_10 = arith.constant 0 : index
    %7 = vector.load %arg6[%c0_8, %c0_9, %c0_10] : memref<2x4x128xf32, #tpu.memory_space<vmem>>, vector<2x4x128xf32>
    %cst_11 = arith.constant dense<0.000000e+00> : vector<2x4x128xf32>
    %8 = vector.multi_reduction <add>, %6, %cst_11 [2] : vector<2x4x2x128xf32> to vector<2x4x128xf32>
    %9 = arith.addf %7, %8 : vector<2x4x128xf32>
    %c0_12 = arith.constant 0 : index
    %c0_13 = arith.constant 0 : index
    %c0_14 = arith.constant 0 : index
    %10 = vector.load %arg6[%c0_12, %c0_13, %c0_14] : memref<2x4x128xf32, #tpu.memory_space<vmem>>, vector<2x4x128xf32>
    tpu.vector_store %arg6[%c0_12, %c0_13, %c0_14], %9 {strides = array<i32>} : memref<2x4x128xf32, #tpu.memory_space<vmem>>, vector<2x4x128xf32>,
    %c0_15 = arith.constant 0 : index
    %c0_16 = arith.constant 0 : index
    %c0_17 = arith.constant 0 : index
    %11 = vector.load %arg7[%c0_15, %c0_16, %c0_17] : memref<2x4x128xf32, #tpu.memory_space<vmem>>, vector<2x4x128xf32>
    %cst_18 = arith.constant dense<0.000000e+00> : vector<2x4x128xf32>
    %12 = vector.multi_reduction <add>, %5, %cst_18 [2] : vector<2x4x2x128xf32> to vector<2x4x128xf32>
    %13 = arith.addf %11, %12 : vector<2x4x128xf32>
    %c0_19 = arith.constant 0 : index
    %c0_20 = arith.constant 0 : index
    %c0_21 = arith.constant 0 : index
    %14 = vector.load %arg7[%c0_19, %c0_20, %c0_21] : memref<2x4x128xf32, #tpu.memory_space<vmem>>, vector<2x4x128xf32>
    tpu.vector_store %arg7[%c0_19, %c0_20, %c0_21], %13 {strides = array<i32>} : memref<2x4x128xf32, #tpu.memory_space<vmem>>, vector<2x4x128xf32>,
    %c0_22 = arith.constant 0 : index
    %c0_23 = arith.constant 0 : index
    %c0_24 = arith.constant 0 : index
    %15 = vector.load %arg8[%c0_22, %c0_23, %c0_24] : memref<2x4x128xf32, #tpu.memory_space<vmem>>, vector<2x4x128xf32>
    %16 = arith.mulf %5, %6 : vector<2x4x2x128xf32>
    %cst_25 = arith.constant dense<0.000000e+00> : vector<2x4x128xf32>
    %17 = vector.multi_reduction <add>, %16, %cst_25 [2] : vector<2x4x2x128xf32> to vector<2x4x128xf32>
    %18 = arith.addf %15, %17 : vector<2x4x128xf32>
    %c0_26 = arith.constant 0 : index
    %c0_27 = arith.constant 0 : index
    %c0_28 = arith.constant 0 : index
    %19 = vector.load %arg8[%c0_26, %c0_27, %c0_28] : memref<2x4x128xf32, #tpu.memory_space<vmem>>, vector<2x4x128xf32>
    tpu.vector_store %arg8[%c0_26, %c0_27, %c0_28], %18 {strides = array<i32>} : memref<2x4x128xf32, #tpu.memory_space<vmem>>, vector<2x4x128xf32>,
    %c0_i32_29 = arith.constant 0 : i32
    %20 = arith.cmpi eq, %arg1, %c0_i32_29 : i32
    %21 = arith.extui %20 : i1 to i32
    %c0_i32_30 = arith.constant 0 : i32
    %22 = arith.cmpi ne, %21, %c0_i32_30 : i32
    scf.if %22 {
      %c0_31 = arith.constant 0 : index
      %23 = memref.load %arg2[%c0_31] : memref<1xf32, #tpu.memory_space<smem>>
      %c0_32 = arith.constant 0 : index
      %c0_33 = arith.constant 0 : index
      %c0_34 = arith.constant 0 : index
      %24 = vector.load %arg6[%c0_32, %c0_33, %c0_34] : memref<2x4x128xf32, #tpu.memory_space<vmem>>, vector<2x4x128xf32>
      %cst_35 = arith.constant dense<0.000000e+00> : vector<2x4xf32>
      %25 = vector.multi_reduction <add>, %24, %cst_35 [2] : vector<2x4x128xf32> to vector<2x4xf32>
      %c0_36 = arith.constant 0 : index
      %c0_37 = arith.constant 0 : index
      %c0_38 = arith.constant 0 : index
      %26 = vector.load %arg7[%c0_36, %c0_37, %c0_38] : memref<2x4x128xf32, #tpu.memory_space<vmem>>, vector<2x4x128xf32>
      %cst_39 = arith.constant dense<0.000000e+00> : vector<2x4xf32>
      %27 = vector.multi_reduction <add>, %26, %cst_39 [2] : vector<2x4x128xf32> to vector<2x4xf32>
      %c0_40 = arith.constant 0 : index
      %c0_41 = arith.constant 0 : index
      %c0_42 = arith.constant 0 : index
      %28 = vector.load %arg8[%c0_40, %c0_41, %c0_42] : memref<2x4x128xf32, #tpu.memory_space<vmem>>, vector<2x4x128xf32>
      %cst_43 = arith.constant dense<0.000000e+00> : vector<2x4xf32>
      %29 = vector.multi_reduction <add>, %28, %cst_43 [2] : vector<2x4x128xf32> to vector<2x4xf32>
      %cst_44 = arith.constant 1.000000e-10 : f32
      %30 = vector.broadcast %cst_44 : f32 to vector<2x4xf32>
      %31 = arith.addf %25, %30 : vector<2x4xf32>
      %32 = arith.mulf %31, %31 : vector<2x4xf32>
      %cst_45 = arith.constant 1.000000e+00 : f32
      %33 = vector.broadcast %cst_45 : f32 to vector<2x4xf32>
      %34 = arith.divf %33, %32 : vector<2x4xf32>
      %35 = arith.mulf %34, %29 : vector<2x4xf32>
      %cst_46 = arith.constant dense<0.000000e+00> : vector<2xf32>
      %36 = vector.multi_reduction <add>, %35, %cst_46 [1] : vector<2x4xf32> to vector<2xf32>
      %37 = arith.addf %27, %25 : vector<2x4xf32>
      %38 = arith.mulf %34, %37 : vector<2x4xf32>
      %cst_47 = arith.constant dense<0.000000e+00> : vector<2xf32>
      %39 = vector.multi_reduction <add>, %38, %cst_47 [1] : vector<2x4xf32> to vector<2xf32>
      %cst_48 = arith.constant 9.99999974E-6 : f32
      %40 = vector.broadcast %cst_48 : f32 to vector<2xf32>
      %41 = arith.addf %36, %40 : vector<2xf32>
      %cst_49 = arith.constant 2.000000e+00 : f32
      %42 = vector.broadcast %cst_49 : f32 to vector<2xf32>
      %43 = arith.mulf %42, %41 : vector<2xf32>
      %cst_50 = arith.constant 9.99999974E-6 : f32
      %44 = vector.broadcast %cst_50 : f32 to vector<2xf32>
      %45 = arith.addf %39, %44 : vector<2xf32>
      %46 = arith.divf %43, %45 : vector<2xf32>
      %cst_51 = arith.constant 1.000000e+00 : f32
      %47 = vector.broadcast %cst_51 : f32 to vector<2xf32>
      %48 = arith.subf %47, %46 : vector<2xf32>
      %cst_52 = arith.constant dense<0.000000e+00> : vector<2xf32>
      %49 = vector.multi_reduction <add>, %29, %cst_52 [1] : vector<2x4xf32> to vector<2xf32>
      %cst_53 = arith.constant 9.765625E-4 : f32
      %50 = vector.broadcast %cst_53 : f32 to vector<2xf32>
      %51 = arith.mulf %49, %50 : vector<2xf32>
      %52 = vector.broadcast %23 : f32 to vector<2xf32>
      %53 = arith.mulf %52, %48 : vector<2xf32>
      %cst_54 = arith.constant 1.000000e+00 : f32
      %54 = arith.subf %cst_54, %23 : f32
      %55 = vector.broadcast %54 : f32 to vector<2xf32>
      %56 = arith.mulf %55, %51 : vector<2xf32>
      %57 = arith.addf %53, %56 : vector<2xf32>
      %58 = vector.shape_cast %57 : vector<2xf32> to vector<2x1xf32>
      %c0_55 = arith.constant 0 : index
      %c0_56 = arith.constant 0 : index
      %59 = vector.load %arg5[%c0_55, %c0_56] : memref<2x1xf32, #tpu.memory_space<vmem>>, vector<2x1xf32>
      tpu.vector_store %arg5[%c0_55, %c0_56], %58 {strides = array<i32>} : memref<2x1xf32, #tpu.memory_space<vmem>>, vector<2x1xf32>,
    } else {
    }
    return
  }
  func.func @transform_0(%arg0: i32, %arg1: i32) -> i32 {
    %c0_i32 = arith.constant 0 : i32
    %c0_i32_0 = arith.constant 0 : i32
    return %c0_i32 : i32
  }
  func.func @transform_1(%arg0: i32, %arg1: i32) -> (i32, i32, i32, i32) {
    %c0_i32 = arith.constant 0 : i32
    %c0_i32_0 = arith.constant 0 : i32
    %c0_i32_1 = arith.constant 0 : i32
    return %arg0, %c0_i32, %arg1, %c0_i32_0 : i32, i32, i32, i32
  }
  func.func @transform_2(%arg0: i32, %arg1: i32) -> (i32, i32, i32, i32) {
    %c0_i32 = arith.constant 0 : i32
    %c0_i32_0 = arith.constant 0 : i32
    %c0_i32_1 = arith.constant 0 : i32
    return %arg0, %c0_i32, %arg1, %c0_i32_0 : i32, i32, i32, i32
  }
  func.func @transform_3(%arg0: i32, %arg1: i32) -> (i32, i32) {
    %c0_i32 = arith.constant 0 : i32
    %c0_i32_0 = arith.constant 0 : i32
    return %arg0, %c0_i32 : i32, i32
  }
}

</mosaic_0001>

<bundles_post_ra>
// kernel: tpu_custom_call.1
= control target key start
LH: loop header
LB: loop body
LE: loop exit
PB: predicated region body
PF: predicated region fallthrough
CT: control target
= control target key end

     0   :  { %9 = vsyncpa [#allocation7], 0  ;;  %s640_s0 = inlined_call_operand.<no memory space> [shape: f32[1], index: 0, kind: input, shape index: {}]   ;;  %s641_s1 = inlined_call_operand.hbm [shape: f32[2,4,2,128], index: 1, kind: input, shape index: {}]   ;;  %s642_s2 = inlined_call_operand.hbm [shape: f32[2,4,2,128], index: 2, kind: input, shape index: {}]   ;;  %s643_s3 = inlined_call_operand.vmem [shape: f32[2,1], index: 3, kind: output, shape index: {}]  }
   0x1   :  { %10 = vsyncpa [#allocation9], 0  ;;  %s490_s12 = smov [#allocation6]  }
   0x2   :  { %s18_s13 = sshll.u32 %s490_s12, 4  ;;  %s19_s13 = int_to_ptr.vmem [resolvable:$true] %s18_s13 }
   0x3   :  { %s454_s14 = scalar_lea.vmem %s19_s13, 256  ;;  %p459_p1 = scmp.lt.s32.totalorder %s19_s13, %s19_s13 }
   0x4   :  { %p455_p0 = scmp.ne.s32.totalorder %s19_s13, %s454_s14  ;;  %p460_p2 = scmp.lt.s32.totalorder %s454_s14, %s454_s14 }
   0x6   :  { %p461_p3 = por %p460_p2, %p459_p1 }
   0x8   :  { %p462_p4 = pnand %p461_p3, %p455_p0 }
   0xa   :  { %465 = shalt.err (!%p462_p4)
}
   0xb   :  { %s491_s15 = smov 32   ;;  %s492_s16 = smov 2  }
   0xc   :  { %24 = dma.hbm_to_vmem [thread:$0]  %s641_s1, 256, %s19_s13, [#allocation7], %s491_s15, %s491_s15, %s492_s16  }
   0xd   :  { %s493_s19 = smov [#allocation8]  }
   0xe   :  { %s30_s20 = sshll.u32 %s493_s19, 4  ;;  %s31_s20 = int_to_ptr.vmem [resolvable:$true] %s30_s20 }
   0xf   :  { %s474_s21 = scalar_lea.vmem %s31_s20, 256  ;;  %p479_p6 = scmp.lt.s32.totalorder %s31_s20, %s31_s20 }
  0x10   :  { %p475_p5 = scmp.ne.s32.totalorder %s31_s20, %s474_s21  ;;  %p480_p7 = scmp.lt.s32.totalorder %s474_s21, %s474_s21 }
  0x12   :  { %p481_p8 = por %p480_p7, %p479_p6 }
  0x14   :  { %p482_p9 = pnand %p481_p8, %p475_p5 }
  0x16   :  { %485 = shalt.err (!%p482_p9)
}
  0x17   :  { %36 = dma.hbm_to_vmem [thread:$0]  %s642_s2, 256, %s31_s20, [#allocation9], %s491_s15, %s491_s15, %s492_s16  }
  0x18   :  { %486 = dma.done.wait [#allocation7], 256  }
  0x19   :  { %487 = vsyncadd [#allocation7], 4294967040 }
  0x1a   :  { %488 = dma.done.wait [#allocation9], 256  }
  0x1b   :  { %489 = vsyncadd [#allocation9], 4294967040  ;;  %v494_v0 = vmov 0.0   ;;  %vm79_vm0 = vcmask 1041408   ;;  %v53_v1 = vld [vmem:[#allocation6] sm:$0x3] }
  0x1c   :  { %47 = vst [vmem:[#allocation2] sm:$0xf] %v494_v0  ;;  %48 = vst [vmem:[#allocation2 + $0x4] sm:$0xf] %v494_v0  ;;  %v54_v2 = vld [vmem:[#allocation6 + $0x2] sm:$0x3] }
  0x1d   :  { %49 = vst [vmem:[#allocation3] sm:$0xf] %v494_v0  ;;  %50 = vst [vmem:[#allocation3 + $0x4] sm:$0xf] %v494_v0  ;;  %v55_v3 = vld [vmem:[#allocation6 + $0x4] sm:$0x3] }
  0x1e   :  { %51 = vst [vmem:[#allocation4] sm:$0xf] %v494_v0  ;;  %52 = vst [vmem:[#allocation4 + $0x4] sm:$0xf] %v494_v0  ;;  %v56_v4 = vld [vmem:[#allocation6 + $0x6] sm:$0x3] }
  0x1f   :  { %v61_v5 = vmax.f32 %v53_v1, 1e-08  ;;  %v62_v6 = vmax.f32 %v54_v2, 1e-08  ;;  %v63_v7 = vmax.f32 %v55_v3, 1e-08 }
  0x20   :  { %v64_v8 = vmax.f32 %v56_v4, 1e-08  ;;  %v69_v9 = vld [vmem:[#allocation8] sm:$0x3]  ;;  %v70_v10 = vld [vmem:[#allocation8 + $0x2] sm:$0x3] }
  0x21   :  { %v71_v11 = vld [vmem:[#allocation8 + $0x4] sm:$0x3]  ;;  %v72_v12 = vld [vmem:[#allocation8 + $0x6] sm:$0x3]  ;;  %v521_v13 = vmul.f32 %v69_v9, %v61_v5  ;;  %v80_v14 = vsel %vm79_vm0, %v69_v9, 0.0  ;;  %v87_v15 = vsel %vm79_vm0, %v70_v10, 0.0  ;;  %v527_v22 = vmul.f32 %v70_v10, %v62_v6 }
  0x22   :  { %v94_v16 = vsel %vm79_vm0, %v71_v11, 0.0  ;;  %v101_v17 = vsel %vm79_vm0, %v72_v12, 0.0  ;;  %v81_v18 = vrot.slane %v80_v14, 4  ;;  %v88_v19 = vrot.slane %v87_v15, 4  ;;  %v537_v50 = vld [vmem:[#allocation8 + $0x8] sm:$0x3] }
  0x23   :  { %v95_v20 = vrot.slane %v94_v16, 4  ;;  %v102_v21 = vrot.slane %v101_v17, 4  ;;  %vm144_vm1 = vcmask 1041409   ;;  %v529_v23 = vmul.f32 %v71_v11, %v63_v7  ;;  %v539_v55 = vld [vmem:[#allocation8 + $0xa] sm:$0x3]  ;;  %s423_s24 = ssub.f32 1.0, %s640_s0 }
  0x24   :  { %v531_v24 = vmul.f32 %v72_v12, %v64_v8  ;;  %v161_v25 = vsel %vm79_vm0, %v61_v5, 0.0  ;;  %v82_v26 = vadd.f32 %v81_v18, %v80_v14  ;;  %v89_v27 = vadd.f32 %v88_v19, %v87_v15  ;;  %v541_v60 = vld [vmem:[#allocation8 + $0xc] sm:$0x3]  ;;  %v77_v5 = vld [vmem:[#allocation2] sm:$0xf] }
  0x25   :  { %v96_v28 = vadd.f32 %v95_v20, %v94_v16  ;;  %v103_v29 = vadd.f32 %v102_v21, %v101_v17  ;;  %vm146_vm2 = vcmask 1042434   ;;  %vm148_vm3 = vcmask 1043459   ;;  %v551_v15 = vld [vmem:[#allocation8 + $0xe] sm:$0x3]  ;;  %v554_v20 = vld [vmem:[#allocation6 + $0x8] sm:$0x3] }
  0x26   :  { %v162_v30 = vrot.slane %v161_v25, 4  ;;  %v168_v31 = vsel %vm79_vm0, %v62_v6, 0.0  ;;  %v175_v32 = vsel %vm79_vm0, %v63_v7, 0.0  ;;  %v182_v33 = vsel %vm79_vm0, %v64_v8, 0.0 }
  0x27   :  { %v83_v34 = vrot.slane %v82_v26, 2  ;;  %v90_v35 = vrot.slane %v89_v27, 2  ;;  %v97_v36 = vrot.slane %v96_v28, 2  ;;  %v104_v37 = vrot.slane %v103_v29, 2 }
  0x28   :  { %v163_v38 = vadd.f32 %v162_v30, %v161_v25  ;;  %v169_v39 = vrot.slane %v168_v31, 4  ;;  %v176_v40 = vrot.slane %v175_v32, 4  ;;  %v183_v41 = vrot.slane %v182_v33, 4 }
  0x29   :  { %v84_v42 = vadd.f32 %v83_v34, %v82_v26  ;;  %v91_v43 = vadd.f32 %v90_v35, %v89_v27  ;;  %v98_v44 = vadd.f32 %v97_v36, %v96_v28  ;;  %v105_v45 = vadd.f32 %v104_v37, %v103_v29  ;;  %v556_v28 = vld [vmem:[#allocation6 + $0xa] sm:$0x3]  ;;  %v159_v29 = vld [vmem:[#allocation3] sm:$0xf]  ;;  %v560_v34 = vld [vmem:[#allocation6 + $0xc] sm:$0x3] }
  0x2a   :  { %v164_v46 = vrot.slane %v163_v38, 2  ;;  %v170_v47 = vadd.f32 %v169_v39, %v168_v31  ;;  %v177_v48 = vadd.f32 %v176_v40, %v175_v32  ;;  %v184_v49 = vadd.f32 %v183_v41, %v182_v33 }
  0x2b   :  { %v85_v51 = vrot.slane %v84_v42, 1  ;;  %v92_v52 = vrot.slane %v91_v43, 1  ;;  %v99_v53 = vrot.slane %v98_v44, 1  ;;  %v106_v54 = vrot.slane %v105_v45, 1 }
  0x2c   :  { %v165_v56 = vadd.f32 %v164_v46, %v163_v38  ;;  %v171_v57 = vrot.slane %v170_v47, 2  ;;  %v178_v58 = vrot.slane %v177_v48, 2  ;;  %v185_v59 = vrot.slane %v184_v49, 2  ;;  %v563_v38 = vld [vmem:[#allocation6 + $0xe] sm:$0x3] }
  0x2d   :  { %v86_v61 = vadd.f32 %v85_v51, %v84_v42  ;;  %v93_v62 = vadd.f32 %v92_v52, %v91_v43  ;;  %v100_v63 = vadd.f32 %v99_v53, %v98_v44  ;;  %v107_v0 = vadd.f32 %v106_v54, %v105_v45 }
  0x2e   :  { %v166_v1 = vrot.slane %v165_v56, 1  ;;  %v172_v2 = vadd.f32 %v171_v57, %v170_v47  ;;  %v179_v3 = vadd.f32 %v178_v58, %v177_v48  ;;  %v186_v4 = vadd.f32 %v185_v59, %v184_v49 }
  0x2f   :  { %v145_v6 = vsel %vm144_vm1, %v93_v62, %v86_v61  ;;  %v108_v7 = vsel %vm79_vm0, %v537_v50, 0.0  ;;  %v115_v8 = vsel %vm79_vm0, %v539_v55, 0.0  ;;  %v122_v9 = vsel %vm79_vm0, %v541_v60, 0.0 }
  0x30   :  { %v147_v10 = vsel %vm146_vm2, %v100_v63, %v145_v6  ;;  %v167_v11 = vadd.f32 %v166_v1, %v165_v56  ;;  %v173_v12 = vrot.slane %v172_v2, 1  ;;  %v180_v14 = vrot.slane %v179_v3, 1 }
  0x31   :  { %v149_v16 = vsel %vm148_vm3, %v107_v0, %v147_v10  ;;  %vm329_vm4 = vcmask 1043456   ;;  %v187_v17 = vrot.slane %v186_v4, 1  ;;  %v109_v18 = vrot.slane %v108_v7, 4 }
  0x32   :  { %v116_v19 = vrot.slane %v115_v8, 4  ;;  %v155_v21 = vadd.f32 %v149_v16, %v77_v5  ;;  %v174_v25 = vadd.f32 %v173_v12, %v172_v2  ;;  %v181_v26 = vadd.f32 %v180_v14, %v179_v3 }
  0x33   :  { %v123_v27 = vrot.slane %v122_v9, 4  ;;  %v188_v30 = vadd.f32 %v187_v17, %v186_v4  ;;  %v110_v31 = vadd.f32 %v109_v18, %v108_v7  ;;  %v129_v33 = vsel %vm79_vm0, %v551_v15, 0.0  ;;  %v78_v18 = vld [vmem:[#allocation2 + $0x4] sm:$0xf] }
  0x34   :  { %v117_v32 = vadd.f32 %v116_v19, %v115_v8  ;;  %157 = vst [vmem:[#allocation2] sm:$0xf] %v155_v21  ;;  %v225_v35 = vsel %vm144_vm1, %v174_v25, %v167_v11  ;;  %v130_v37 = vrot.slane %v129_v33, 4  ;;  %v65_v39 = vmax.f32 %v554_v20, 1e-08 }
  0x35   :  { %v124_v36 = vadd.f32 %v123_v27, %v122_v9  ;;  %v226_v40 = vsel %vm146_vm2, %v181_v26, %v225_v35  ;;  %v111_v41 = vrot.slane %v110_v31, 2  ;;  %v66_v43 = vmax.f32 %v556_v28, 1e-08 }
  0x36   :  { %v118_v42 = vrot.slane %v117_v32, 2  ;;  %v227_v44 = vsel %vm148_vm3, %v188_v30, %v226_v40  ;;  %v131_v46 = vadd.f32 %v130_v37, %v129_v33  ;;  %v67_v47 = vmax.f32 %v560_v34, 1e-08 }
  0x37   :  { %v125_v45 = vrot.slane %v124_v36, 2  ;;  %v233_v48 = vadd.f32 %v227_v44, %v159_v29  ;;  %v112_v49 = vadd.f32 %v111_v41, %v110_v31  ;;  %v68_v52 = vmax.f32 %v563_v38, 1e-08 }
  0x38   :  { %v119_v51 = vadd.f32 %v118_v42, %v117_v32  ;;  %v132_v54 = vrot.slane %v131_v46, 2  ;;  %v189_v56 = vsel %vm79_vm0, %v65_v39, 0.0  ;;  %v196_v57 = vsel %vm79_vm0, %v66_v43, 0.0 }
  0x39   :  { %v126_v53 = vadd.f32 %v125_v45, %v124_v36  ;;  %235 = vst [vmem:[#allocation3] sm:$0xf] %v233_v48  ;;  %v113_v58 = vrot.slane %v112_v49, 1  ;;  %v190_v61 = vrot.slane %v189_v56, 4  ;;  %v197_v62 = vrot.slane %v196_v57, 4 }
  0x3a   :  { %v120_v59 = vrot.slane %v119_v51, 1  ;;  %v133_v0 = vadd.f32 %v132_v54, %v131_v46  ;;  %v203_v1 = vsel %vm79_vm0, %v67_v47, 0.0  ;;  %v210_v2 = vsel %vm79_vm0, %v68_v52, 0.0 }
  0x3b   :  { %v127_v63 = vrot.slane %v126_v53, 1  ;;  %v327_v3 = vld [vmem:[#allocation2] sm:$0xf]  ;;  %v114_v4 = vadd.f32 %v113_v58, %v112_v49  ;;  %v191_v6 = vadd.f32 %v190_v61, %v189_v56  ;;  %v198_v7 = vadd.f32 %v197_v62, %v196_v57 }
  0x3c   :  { %v121_v5 = vadd.f32 %v120_v59, %v119_v51  ;;  %v330_v8 = vsel %vm329_vm4, %v327_v3, 0.0  ;;  %v134_v10 = vrot.slane %v133_v0, 1  ;;  %v204_v11 = vrot.slane %v203_v1, 4 }
  0x3d   :  { %v128_v9 = vadd.f32 %v127_v63, %v126_v53  ;;  %331 = vadd.xlane.f32.xlu0 %v330_v8  ;;  %v192_v14 = vrot.slane %v191_v6, 2  ;;  %v199_v16 = vrot.slane %v198_v7, 2  ;;  %v211_v17 = vrot.slane %v210_v2, 4 }
  0x3e   :  { %v150_v12 = vsel %vm144_vm1, %v121_v5, %v114_v4  ;;  %v135_v19 = vadd.f32 %v134_v10, %v133_v0  ;;  %v205_v25 = vadd.f32 %v204_v11, %v203_v1  ;;  %v247_v26 = vsel %vm79_vm0, %v521_v13, 0.0 }
  0x3f   :  { %v151_v21 = vsel %vm146_vm2, %v128_v9, %v150_v12  ;;  %v193_v27 = vadd.f32 %v192_v14, %v191_v6  ;;  %v200_v29 = vadd.f32 %v199_v16, %v198_v7  ;;  %v212_v30 = vadd.f32 %v211_v17, %v210_v2  ;;  %v160_v6 = vld [vmem:[#allocation3 + $0x4] sm:$0xf] }
  0x40   :  { %v248_v31 = vrot.slane %v247_v26, 4  ;;  %v336_v32 = vld [vmem:[#allocation3] sm:$0xf]  ;;  %v152_v33 = vsel %vm148_vm3, %v135_v19, %v151_v21  ;;  %v206_v35 = vrot.slane %v205_v25, 2  ;;  %v254_v36 = vsel %vm79_vm0, %v527_v22, 0.0 }
  0x41   :  { %v261_v37 = vsel %vm79_vm0, %v529_v23, 0.0  ;;  %v338_v40 = vsel %vm329_vm4, %v336_v32, 0.0  ;;  %v156_v41 = vadd.f32 %v152_v33, %v78_v18  ;;  %v194_v42 = vrot.slane %v193_v27, 1 }
  0x42   :  { %v201_v44 = vrot.slane %v200_v29, 1  ;;  %339 = vadd.xlane.f32.xlu1 %v338_v40  ;;  %v207_v13 = vadd.f32 %v206_v35, %v205_v25  ;;  %v213_v45 = vrot.slane %v212_v30, 2  ;;  %v249_v46 = vadd.f32 %v248_v31, %v247_v26 }
  0x43   :  { %v255_v48 = vrot.slane %v254_v36, 4  ;;  %158 = vst [vmem:[#allocation2 + $0x4] sm:$0xf] %v156_v41  ;;  %v195_v49 = vadd.f32 %v194_v42, %v193_v27  ;;  %v262_v53 = vrot.slane %v261_v37, 4  ;;  %v268_v22 = vsel %vm79_vm0, %v531_v24, 0.0 }
  0x44   :  { %v202_v51 = vadd.f32 %v201_v44, %v200_v29  ;;  %v208_v54 = vrot.slane %v207_v13, 1  ;;  %v214_v56 = vadd.f32 %v213_v45, %v212_v30  ;;  %v250_v23 = vrot.slane %v249_v46, 2  ;;  %v237_v30 = vld [vmem:[#allocation4] sm:$0xf] }
  0x45   :  { %v256_v57 = vadd.f32 %v255_v48, %v254_v36  ;;  %v263_v59 = vadd.f32 %v262_v53, %v261_v37  ;;  %v269_v61 = vrot.slane %v268_v22, 4  ;;  %v243_v62 = vmul.f32 %v537_v50, %v65_v39 }
  0x46   :  { %v228_v58 = vsel %vm144_vm1, %v202_v51, %v195_v49  ;;  %v209_v63 = vadd.f32 %v208_v54, %v207_v13  ;;  %v215_v0 = vrot.slane %v214_v56, 1  ;;  %v251_v1 = vadd.f32 %v250_v23, %v249_v46 }
  0x47   :  { %v257_v2 = vrot.slane %v256_v57, 2  ;;  %v264_v3 = vrot.slane %v263_v59, 2  ;;  %v270_v4 = vadd.f32 %v269_v61, %v268_v22  ;;  %v244_v24 = vmul.f32 %v539_v55, %v66_v43 }
  0x48   :  { %v245_v5 = vmul.f32 %v541_v60, %v67_v47  ;;  %v216_v7 = vadd.f32 %v215_v0, %v214_v56  ;;  %v229_v20 = vsel %vm146_vm2, %v209_v63, %v228_v58  ;;  %v252_v8 = vrot.slane %v251_v1, 1 }
  0x49   :  { %v258_v50 = vadd.f32 %v257_v2, %v256_v57  ;;  %v265_v39 = vadd.f32 %v264_v3, %v263_v59  ;;  %v271_v9 = vrot.slane %v270_v4, 2  ;;  %v246_v10 = vmul.f32 %v551_v15, %v68_v52 }
  0x4a   :  { %v275_v28 = vsel %vm79_vm0, %v243_v62, 0.0  ;;  %v328_v11 = vld [vmem:[#allocation2 + $0x4] sm:$0xf]  ;;  %v230_v55 = vsel %vm148_vm3, %v216_v7, %v229_v20  ;;  %v253_v34 = vadd.f32 %v252_v8, %v251_v1  ;;  %v282_v38 = vsel %vm79_vm0, %v244_v24, 0.0  ;;  %v238_v62 = vld [vmem:[#allocation4 + $0x4] sm:$0xf] }
  0x4b   :  { %v259_v43 = vrot.slane %v258_v50, 1  ;;  %v276_v60 = vrot.slane %v275_v28, 4  ;;  %v333_v47 = vsel %vm329_vm4, %v328_v11, 0.0  ;;  %v234_v12 = vadd.f32 %v230_v55, %v160_v6 }
  0x4c   :  { %v266_v14 = vrot.slane %v265_v39, 1  ;;  %v272_v16 = vadd.f32 %v271_v9, %v270_v4  ;;  %334 = vadd.xlane.f32.xlu0 %v333_v47  ;;  %v289_v15 = vsel %vm79_vm0, %v245_v5, 0.0  ;;  %v283_v21 = vrot.slane %v282_v38, 4 }
  0x4d   :  { %v260_v17 = vadd.f32 %v259_v43, %v258_v50  ;;  %v277_v18 = vadd.f32 %v276_v60, %v275_v28  ;;  %236 = vst [vmem:[#allocation3 + $0x4] sm:$0xf] %v234_v12  ;;  %v290_v25 = vrot.slane %v289_v15, 4  ;;  %v296_v29 = vsel %vm79_vm0, %v246_v10, 0.0 }
  0x4e   :  { %v267_v52 = vadd.f32 %v266_v14, %v265_v39  ;;  %v273_v19 = vrot.slane %v272_v16, 1  ;;  %v284_v33 = vadd.f32 %v283_v21, %v282_v38  ;;  %v297_v37 = vrot.slane %v296_v29, 4 }
  0x4f   :  { %v311_v26 = vsel %vm144_vm1, %v260_v17, %v253_v34  ;;  %v278_v27 = vrot.slane %v277_v18, 2  ;;  %v291_v35 = vadd.f32 %v290_v25, %v289_v15  ;;  %v364_v10 = vlaneseq }
  0x50   :  { %v274_v31 = vadd.f32 %v273_v19, %v272_v16  ;;  %v312_v32 = vsel %vm146_vm2, %v267_v52, %v311_v26  ;;  %v285_v41 = vrot.slane %v284_v33, 2  ;;  %v298_v45 = vadd.f32 %v297_v37, %v296_v29 }
  0x51   :  { %v279_v36 = vadd.f32 %v278_v27, %v277_v18  ;;  %v292_v42 = vrot.slane %v291_v35, 2  ;;  %v365_v28 = vand.u32 127, %v364_v10  ;;  %v367_v11 = vshrl.u32 %v364_v10, 7 }
  0x52   :  { %v313_v40 = vsel %vm148_vm3, %v274_v31, %v312_v32  ;;  %v286_v46 = vadd.f32 %v285_v41, %v284_v33  ;;  %v299_v51 = vrot.slane %v298_v45, 2  ;;  %vm376_vm5 = vcmask 25600  }
  0x53   :  { %v319_v44 = vadd.f32 %v313_v40, %v237_v30  ;;  %v280_v13 = vrot.slane %v279_v36, 1  ;;  %v293_v48 = vadd.f32 %v292_v42, %v291_v35  ;;  %v368_v60 = vsub.s32 %v365_v28, %v367_v11 }
  0x54   :  { %v337_v49 = vld [vmem:[#allocation3 + $0x4] sm:$0xf]  ;;  %v287_v54 = vrot.slane %v286_v46, 1  ;;  %v300_v23 = vadd.f32 %v299_v51, %v298_v45  ;;  %vm427_vm6 = vcmask 1024  }
  0x55   :  { %321 = vst [vmem:[#allocation4] sm:$0xf] %v319_v44  ;;  %v341_v53 = vsel %vm329_vm4, %v337_v49, 0.0  ;;  %v281_v22 = vadd.f32 %v280_v13, %v279_v36  ;;  %v294_v56 = vrot.slane %v293_v48, 1  ;;  %v424_v49 = vstv %s423_s24 }
  0x56   :  { %342 = vadd.xlane.f32.xlu1 %v341_v53  ;;  %v288_v57 = vadd.f32 %v287_v54, %v286_v46  ;;  %v301_v59 = vrot.slane %v300_v23, 1 }
  0x57   :  { %v295_v58 = vadd.f32 %v294_v56, %v293_v48  ;;  %v421_v48 = vstv %s640_s0 }
  0x58   :  { %v314_v61 = vsel %vm144_vm1, %v288_v57, %v281_v22  ;;  %v302_v63 = vadd.f32 %v301_v59, %v300_v23 }
  0x59   :  { %v315_v0 = vsel %vm146_vm2, %v295_v58, %v314_v61 }
  0x5a   :  { %v316_v3 = vsel %vm148_vm3, %v302_v63, %v315_v0 }
  0x5b   :  { %v320_v4 = vadd.f32 %v316_v3, %v238_v62 }
  0x5c   :  { %v344_v1 = vld [vmem:[#allocation4] sm:$0xf] }
  0x5d   :  { %v346_v2 = vsel %vm329_vm4, %v344_v1, 0.0  ;;  %322 = vst [vmem:[#allocation4 + $0x4] sm:$0xf] %v320_v4 }
  0x5e   :  { %347 = vadd.xlane.f32.xlu0 %v346_v2 }
  0x64   :  { %v345_v24 = vld [vmem:[#allocation4 + $0x4] sm:$0xf] }
  0x65   :  { %v349_v5 = vsel %vm329_vm4, %v345_v24, 0.0 }
  0x66   :  { %350 = vadd.xlane.f32.xlu1 %v349_v5 }
  0xc6   :  { %v332_v6 = vpop.xlane.xlu0 %331 }
  0xc7   :  { %v352_v7 = vadd.f32 1e-10, %v332_v6 }
  0xc9   :  { %v354_v20 = vmul.f32 %v352_v7, %v352_v7 }
  0xcb   :  { %440 = vrcp.f32 %v354_v20  ;;  %v340_v9 = vpop.xlane.xlu1 %339 }
  0xcc   :  { %v380_v43 = vadd.f32 %v340_v9, %v332_v6 }
  0xd5   :  { %v335_v8 = vpop.xlane.xlu0 %334 }
  0xd6   :  { %v353_v50 = vadd.f32 1e-10, %v335_v8 }
  0xd8   :  { %v355_v39 = vmul.f32 %v353_v50, %v353_v50  ;;  %v441_v55 = vpop.eup %440 }
  0xd9   :  { %v382_v47 = vmul.f32 %v441_v55, %v380_v43 }
  0xda   :  { %442 = vrcp.f32 %v355_v39 }
  0xdb   :  { %v389_v17 = vrot.slane %v382_v47, %v368_v60 }
  0xdf   :  { %v343_v34 = vpop.xlane.xlu1 %342 }
  0xe0   :  { %v381_v12 = vadd.f32 %v343_v34, %v335_v8 }
  0xe7   :  { %v443_v14 = vpop.eup %442  ;;  %v348_v15 = vpop.xlane.xlu0 %347 }
  0xe8   :  { %v383_v16 = vmul.f32 %v443_v14, %v381_v12  ;;  %v360_v19 = vmul.f32 %v441_v55, %v348_v15  ;;  %v410_v21 = vrot.slane %v348_v15, %v368_v60 }
  0xea   :  { %v393_v18 = vrot.slane %v383_v16, %v368_v60  ;;  %v369_v29 = vrot.slane %v360_v19, %v368_v60 }
  0xec   :  { %v394_v38 = vsel %vm144_vm1, %v393_v18, %v389_v17 }
  0xed   :  { %v396_v52 = vsel %vm376_vm5, %v394_v38, 0.0 }
  0xee   :  { %397 = vadd.xlane.f32.xlu0 %v396_v52 }
  0xef   :  { %v351_v25 = vpop.xlane.xlu1 %350 }
  0xf0   :  { %v361_v26 = vmul.f32 %v443_v14, %v351_v25  ;;  %v414_v27 = vrot.slane %v351_v25, %v368_v60 }
  0xf2   :  { %v373_v30 = vrot.slane %v361_v26, %v368_v60  ;;  %v415_v31 = vsel %vm144_vm1, %v414_v27, %v410_v21 }
  0xf3   :  { %v417_v32 = vsel %vm376_vm5, %v415_v31, 0.0 }
  0xf4   :  { %v374_v33 = vsel %vm144_vm1, %v373_v30, %v369_v29  ;;  %418 = vadd.xlane.f32.xlu0 %v417_v32 }
  0xf5   :  { %v377_v35 = vsel %vm376_vm5, %v374_v33, 0.0 }
  0xf6   :  { %378 = vadd.xlane.f32.xlu1 %v377_v35 }
 0x177   :  { %v398_v36 = vpop.xlane.xlu0 %397 }
 0x178   :  { %v401_v37 = vadd.f32 1e-05, %v398_v36 }
 0x17a   :  { %444 = vrcp.f32 %v401_v37 }
 0x17d   :  { %v419_v42 = vpop.xlane.xlu0 %418 }
 0x17e   :  { %v420_v46 = vmul.f32 0.0009765625, %v419_v42 }
 0x17f   :  { %v379_v40 = vpop.xlane.xlu1 %378 }
 0x180   :  { %v399_v41 = vadd.f32 1e-05, %v379_v40  ;;  %v425_v22 = vmul.f32 %v424_v49, %v420_v46 }
 0x182   :  { %v400_v44 = vmul.f32 2.0, %v399_v41 }
 0x187   :  { %v445_v13 = vpop.eup %444 }
 0x188   :  { %v403_v45 = vmul.f32 %v445_v13, %v400_v44 }
 0x18a   :  { %v404_v51 = vsub.f32 1.0, %v403_v45 }
 0x18c   :  { %v422_v53 = vmul.f32 %v421_v48, %v404_v51 }
 0x18e   :  { %v426_v54 = vadd.f32 %v425_v22, %v422_v53 }
 0x190   :  { %428 = vst.msk [vmem:[%s643_s3] sm:$0x3] %vm427_vm6, %v426_v54 }
 0x191   :  { %433 = vsyncpa [#allocation7], 1 }
 0x192   :  { %434 = vsyncpa [#allocation9], 1 }

</bundles_post_ra>
